<compile_context>
chip_gen: v6e
topology: v6e:2x2x1
jax: 0.10.0
libtpu: 0.0.40
codegen_flags: <defaults>
</compile_context>

<pallas_src>
import functools
import math

import jax
import jax.numpy as jnp
import numpy as np
from jax.experimental import pallas as pl
from jax.experimental.pallas import tpu as pltpu


def _round_up(x: int, m: int) -> int:
    return ((x + m - 1) // m) * m


def _round_down(x: int, m: int) -> int:
    return (x // m) * m


def _float_encoder_kernel(x_ref, inv_ref, phase_ref, out_ref, *, d_model: int):
    # x_ref:     (TILE_N, 1)       float32   per-row scalar values
    # inv_ref:   (1, d_pad)        float32   [1/sin_term, 1/cos_term, 0-pad]
    # phase_ref: (1, d_pad)        float32   [0..., pi/2..., 0-pad]
    # out_ref:   (TILE_N, d_model) out dtype
    x = x_ref[...]                                   # (TILE_N, 1)
    # Full-lane-width fused compute: cos(t) == sin(t + pi/2).  Padding lanes
    # (inv=0, phase=0) produce sin(0)=0 and are sliced off before the store.
    arg = x * inv_ref[...] + phase_ref[...]          # (TILE_N, d_pad)
    vals = jnp.sin(arg)                              # single VPU sin pass
    out_ref[...] = vals[:, :d_model].astype(out_ref.dtype)


def make_float_encoder_params(d_model: int,
                              min_wavelength: float = 0.001,
                              max_wavelength: float = 10000.0):
    """Deterministic parameter init matching the PyTorch __init__ (float32)."""
    if min_wavelength <= 0 or max_wavelength <= 0:
        raise ValueError("wavelengths must be > 0")
    d_sin = math.ceil(d_model / 2)
    d_cos = d_model - d_sin
    if d_sin < 2 or d_cos < 2:
        # Original formula divides by (d_sin-1)/(d_cos-1); require d_model>=4.
        raise ValueError("d_model must be >= 4 for well-defined wavelengths")
    base = min_wavelength / (2 * np.pi)
    scale = max_wavelength / min_wavelength
    sin_exp = np.arange(0, d_sin, dtype=np.float32) / np.float32(d_sin - 1)
    cos_exp = ((np.arange(d_sin, d_model, dtype=np.float32) - d_sin)
               / np.float32(d_cos - 1))
    sin_term = (base * scale ** sin_exp).astype(np.float32)   # (d_sin,)
    cos_term = (base * scale ** cos_exp).astype(np.float32)   # (d_cos,)
    return jnp.asarray(sin_term), jnp.asarray(cos_term)


def float_encoder(X: jax.Array, sin_term: jax.Array, cos_term: jax.Array,
                  *, tile_rows: int | None = None,
                  out_dtype=jnp.float32) -> jax.Array:
    """X: (batch, seq) -> (batch, seq, d_model)."""
    B, S = X.shape
    d_sin = int(sin_term.shape[0])
    d_cos = int(cos_term.shape[0])
    d_model = d_sin + d_cos
    d_pad = _round_up(d_model, 128)          # full-lane-width compute slab
    N = B * S

    x2 = X.reshape(N, 1).astype(jnp.float32)

    # Fused frequency / phase rows, precomputed once (reciprocal hoisted:
    # the hot loop does mul+add+sin per element, no divide, no second pass).
    inv_sin = 1.0 / sin_term.astype(jnp.float32)
    inv_cos = 1.0 / cos_term.astype(jnp.float32)
    lane_pad = d_pad - d_model
    inv_full = jnp.concatenate(
        [inv_sin, inv_cos, jnp.zeros((lane_pad,), jnp.float32)]).reshape(1, d_pad)
    phase = jnp.concatenate(
        [jnp.zeros((d_sin,), jnp.float32),
         jnp.full((d_cos,), np.float32(np.pi / 2), jnp.float32),
         jnp.zeros((lane_pad,), jnp.float32)]).reshape(1, d_pad)

    # Tile size: ~2 MiB output block (amortizes the ~0.35 us/step grid
    # overhead), capped at 4096 rows, multiple of 8 sublanes.  With explicit
    # vmem_limit_bytes the double-buffered pipeline fits v5e/v6e/v7x.
    if tile_rows is None:
        target = (2 * 1024 * 1024) // (d_pad * 4)
        tile_rows = max(8, min(4096, _round_down(target, 8)))
    tile_rows = min(tile_rows, _round_up(N, 8))
    grid = (pl.cdiv(N, tile_rows),)

    kernel = functools.partial(_float_encoder_kernel, d_model=d_model)

    out_bytes = jnp.dtype(out_dtype).itemsize
    cost = pl.CostEstimate(
        flops=2 * N * d_pad,                 # mul + add per element
        transcendentals=N * d_pad,           # one sin per element
        bytes_accessed=N * 4 + 2 * d_pad * 4 + N * d_model * out_bytes,
    )

    out = pl.pallas_call(
        kernel,
        out_shape=jax.ShapeDtypeStruct((N, d_model), out_dtype),
        grid=grid,
        in_specs=[
            pl.BlockSpec((tile_rows, 1), lambda i: (i, 0)),
            pl.BlockSpec((1, d_pad), lambda i: (0, 0)),
            pl.BlockSpec((1, d_pad), lambda i: (0, 0)),
        ],
        # Block last dim == full array dim (legal for any d_model); avoids a
        # wrapper-side slice pass over the output in HBM.
        out_specs=pl.BlockSpec((tile_rows, d_model), lambda i: (i, 0)),
        compiler_params=pltpu.CompilerParams(
            dimension_semantics=("parallel",),
            vmem_limit_bytes=32 * 1024 * 1024,
        ),
        cost_estimate=cost,
    )(x2, inv_full, phase)

    return out.reshape(B, S, d_model)


def _reference_f64(X, sin_term, cos_term):
    """Ground truth: PyTorch forward semantics (divide, sin/cos, concat),
    evaluated in float64 with NumPy on host using the module's f32 params."""
    X64 = np.asarray(X, np.float64)
    st = np.asarray(sin_term, np.float64)
    ct = np.asarray(cos_term, np.float64)
    arg_sin = X64[:, :, None] / st
    arg_cos = X64[:, :, None] / ct
    ref = np.concatenate([np.sin(arg_sin), np.cos(arg_cos)], axis=-1)
    arg = np.concatenate([arg_sin, arg_cos], axis=-1)
    return ref, arg


if __name__ == "__main__":
    key = jax.random.PRNGKey(0)
    B, S, d_model = 2, 8, 32

    # Positive float inputs (e.g. m/z-like values), deterministic.  Range is
    # kept moderate so the f64 comparison below is meaningful: with
    # min_wavelength=1e-3 the highest-frequency lanes have arguments where any
    # f32 evaluation (including the PyTorch one) is ULP-dominated.
    X = jax.random.uniform(key, (B, S), dtype=jnp.float32,
                           minval=0.0, maxval=10.0)

    sin_term, cos_term = make_float_encoder_params(d_model)

    out = jax.block_until_ready(float_encoder(X, sin_term, cos_term))
    assert out.shape == (B, S, d_model), out.shape

    # Element-wise tolerance proportional to the sin/cos argument magnitude:
    # f32 argument rounding (reciprocal-mul + pi/2 phase add are a few ULPs of
    # the argument) and f32 range reduction both scale with |arg|.  Lanes with
    # small/moderate arguments (most of them) are checked tightly, which
    # verifies wavelengths, sin/cos split and output layout.
    ref, arg = _reference_f64(X, sin_term, cos_term)
    err = np.abs(np.asarray(out, np.float64) - ref)
    tol = 1e-5 * np.abs(arg) + 1e-4
    if not np.all(err <= tol):
        bad = np.unravel_index(np.argmax(err - tol), err.shape)
        raise AssertionError(
            f"mismatch at {bad}: got {np.asarray(out)[bad]}, want {ref[bad]}, "
            f"err {err[bad]}, tol {tol[bad]}")

    print("KERNEL_OK")
</pallas_src>

<mosaic_0001>
module attributes {stable_mosaic.version = 11 : i64} {
  func.func @_float_encoder_kernel(%arg0: i32, %arg1: memref<16x1xf32, #tpu.memory_space<vmem>>, %arg2: memref<1x128xf32, #tpu.memory_space<vmem>>, %arg3: memref<1x128xf32, #tpu.memory_space<vmem>>, %arg4: memref<16x32xf32, #tpu.memory_space<vmem>>) attributes {dimension_semantics = [#tpu.dimension_semantics<parallel>], iteration_bounds = array<i64: 1>, scalar_prefetch = 0 : i64, scratch_operands = 0 : i64, tpu.core_type = #tpu.core_type<tc>, window_params = [{transform_indices = @transform_0, window_bounds = array<i64: 16, 1>}, {pipeline_mode = #tpu.pipeline_mode<synchronous>, transform_indices = @transform_1, window_bounds = array<i64: 1, 128>}, {pipeline_mode = #tpu.pipeline_mode<synchronous>, transform_indices = @transform_2, window_bounds = array<i64: 1, 128>}, {transform_indices = @transform_3, window_bounds = array<i64: 16, 32>}]} {
    %c0 = arith.constant 0 : index
    %c0_0 = arith.constant 0 : index
    %0 = vector.load %arg1[%c0, %c0_0] : memref<16x1xf32, #tpu.memory_space<vmem>>, vector<16x1xf32>
    %c0_1 = arith.constant 0 : index
    %c0_2 = arith.constant 0 : index
    %1 = vector.load %arg2[%c0_1, %c0_2] : memref<1x128xf32, #tpu.memory_space<vmem>>, vector<1x128xf32>
    %2 = vector.broadcast %0 : vector<16x1xf32> to vector<16x128xf32>
    %3 = vector.broadcast %1 : vector<1x128xf32> to vector<16x128xf32>
    %4 = arith.mulf %2, %3 : vector<16x128xf32>
    %c0_3 = arith.constant 0 : index
    %c0_4 = arith.constant 0 : index
    %5 = vector.load %arg3[%c0_3, %c0_4] : memref<1x128xf32, #tpu.memory_space<vmem>>, vector<1x128xf32>
    %6 = vector.broadcast %5 : vector<1x128xf32> to vector<16x128xf32>
    %7 = arith.addf %4, %6 : vector<16x128xf32>
    %8 = math.sin %7 : vector<16x128xf32>
    %9 = vector.extract_strided_slice %8 {offsets = [0, 0], sizes = [16, 32], strides = [1, 1]} : vector<16x128xf32> to vector<16x32xf32>
    %c0_5 = arith.constant 0 : index
    %c0_6 = arith.constant 0 : index
    %10 = vector.load %arg4[%c0_5, %c0_6] : memref<16x32xf32, #tpu.memory_space<vmem>>, vector<16x32xf32>
    tpu.vector_store %arg4[%c0_5, %c0_6], %9 {strides = array<i32>} : memref<16x32xf32, #tpu.memory_space<vmem>>, vector<16x32xf32>,
    return
  }
  func.func @transform_0(%arg0: i32) -> (i32, i32) {
    %c0_i32 = arith.constant 0 : i32
    %c0_i32_0 = arith.constant 0 : i32
    return %arg0, %c0_i32 : i32, i32
  }
  func.func @transform_1(%arg0: i32) -> (i32, i32) {
    %c0_i32 = arith.constant 0 : i32
    %c0_i32_0 = arith.constant 0 : i32
    %c0_i32_1 = arith.constant 0 : i32
    return %c0_i32, %c0_i32_0 : i32, i32
  }
  func.func @transform_2(%arg0: i32) -> (i32, i32) {
    %c0_i32 = arith.constant 0 : i32
    %c0_i32_0 = arith.constant 0 : i32
    %c0_i32_1 = arith.constant 0 : i32
    return %c0_i32, %c0_i32_0 : i32, i32
  }
  func.func @transform_3(%arg0: i32) -> (i32, i32) {
    %c0_i32 = arith.constant 0 : i32
    %c0_i32_0 = arith.constant 0 : i32
    return %arg0, %c0_i32 : i32, i32
  }
}

</mosaic_0001>

<bundles_post_ra>
// kernel: tpu_custom_call.1
= control target key start
LH: loop header
LB: loop body
LE: loop exit
PB: predicated region body
PF: predicated region fallthrough
CT: control target
= control target key end

     0   :  { %v331_v1 = vmov 0   ;;  %s446_s0 = inlined_call_operand.vmem [shape: f32[16,1], index: 0, kind: input, shape index: {}]   ;;  %s447_s1 = inlined_call_operand.vmem [shape: f32[1,128], index: 1, kind: input, shape index: {}]   ;;  %s448_s2 = inlined_call_operand.vmem [shape: f32[1,128], index: 2, kind: input, shape index: {}]   ;;  %s449_s3 = inlined_call_operand.hbm [shape: f32[16,32], index: 3, kind: output, shape index: {}]  }
   0x1   :  { %v15_v0 = vld [vmem:[%s446_s0] sm:$0xff]  ;;  %300 = vset.pattern.permute.xlu0 %v331_v1  ;;  %v16_v2 = vld [vmem:[%s446_s0 + $0x8] sm:$0xff] }
   0x2   :  { %20 = vperm.xlu0 %300, %v15_v0  }
   0x3   :  { %8 = vsyncpa [#allocation3], 0  ;;  %v272_v3 = vld [vmem:[%s447_s1] ss:$0 sm:$0xff]  ;;  %v332_v27 = vmov 683565275  }
   0x4   :  { %v273_v4 = vld [vmem:[%s448_s2] ss:$0 sm:$0xff]  ;;  %v333_v31 = vmov 2475754826   ;;  %v334_v33 = vmov 2131351028  }
   0x5   :  { %v335_v35 = vmov 2102212464   ;;  %v336_v37 = vmov 920167782   ;;  %v337_v44 = vmov 1326507024  }
   0x6   :  { %25 = vperm.xlu0 %300, %v16_v2   ;;  %s338_s0 = smov [#allocation2]  }
   0x7   :  { %s261_s1 = sshll.u32 %s338_s0, 4  ;;  %s262_s1 = int_to_ptr.vmem [resolvable:$true] %s261_s1 }
   0x8   :  { %s309_s2 = scalar_lea.vmem %s262_s1, 256  ;;  %p314_p1 = scmp.lt.s32.totalorder %s262_s1, %s262_s1 }
   0x9   :  { %p310_p0 = scmp.ne.s32.totalorder %s262_s1, %s309_s2  ;;  %p315_p2 = scmp.lt.s32.totalorder %s309_s2, %s309_s2 }
   0xb   :  { %p316_p3 = por %p315_p2, %p314_p1 }
   0xd   :  { %p317_p4 = pnand %p316_p3, %p310_p0 }
  0x7d   :  { %v21_v5 = vpop.permute.xlu0 %20 }
  0x7e   :  { %v34_v6 = vmul.f32 %v272_v3, %v21_v5 }
  0x80   :  { %v373_v7 = vadd.f32 %v273_v4, %v34_v6 }
  0x81   :  { %v26_v8 = vpop.permute.xlu0 %25 }
  0x82   :  { %v45_v9 = vand.u32 2147483647, %v373_v7  ;;  %v48_v10 = vand.u32 2139095040, %v373_v7  ;;  %v35_v11 = vmul.f32 %v272_v3, %v26_v8  ;;  %vm47_vm14 = vcmp.lt.s32.totalorder %v373_v7, 0 }
  0x84   :  { %v49_v12 = vshrl.u32 %v48_v10, 23  ;;  %v377_v13 = vadd.f32 %v273_v4, %v35_v11  ;;  %v52_v14 = vand.u32 8388607, %v45_v9  ;;  %vm46_vm15 = vcmp.le.f32.partialorder %v45_v9, 0.7853982 }
  0x86   :  { %v274_v15 = vadd.s32 4294967169, %v49_v12  ;;  %v152_v16 = vand.u32 2139095040, %v377_v13  ;;  %v53_v18 = vor.u32 8388608, %v52_v14  ;;  %v149_v20 = vand.u32 2147483647, %v377_v13 }
  0x88   :  { %v55_v17 = vadd.s32 1, %v274_v15  ;;  %v153_v19 = vshrl.u32 %v152_v16, 23  ;;  %v383_v25 = vshll.u32 %v53_v18, 8  ;;  %v156_v29 = vand.u32 8388607, %v149_v20 }
  0x8a   :  { %vm56_vm0 = vcmp.gt.s32.totalorder %v55_v17, 0  ;;  %v278_v22 = vadd.s32 4294967169, %v153_v19  ;;  %v157_v59 = vor.u32 8388608, %v156_v29 }
  0x8b   :  { %v57_v21 = vsel %vm56_vm0, %v55_v17, 0  ;;  %vm151_vm0 = vcmp.lt.s32.totalorder %v377_v13, 0 }
  0x8c   :  { %v58_v23 = vshrl.u32 %v57_v21, 5  ;;  %v59_v24 = vand.u32 31, %v57_v21  ;;  %v159_v30 = vadd.s32 1, %v278_v22  ;;  %v197_v10 = vshll.u32 %v157_v59, 8 }
  0x8e   :  { %v60_v26 = vsub.s32 32, %v59_v24  ;;  %v62_v28 = vshll.u32 %v332_v27, %v59_v24  ;;  %v65_v32 = vshll.u32 %v333_v31, %v59_v24  ;;  %v68_v34 = vshll.u32 %v334_v33, %v59_v24 }
  0x8f   :  { %v71_v36 = vshll.u32 %v335_v35, %v59_v24  ;;  %v74_v38 = vshll.u32 %v336_v37, %v59_v24  ;;  %vm77_vm1 = vcmp.lt.s32.totalorder %v58_v23, 1  ;;  %vm79_vm2 = vcmp.lt.s32.totalorder %v58_v23, 3 }
  0x90   :  { %v63_v39 = vshrl.u32 %v333_v31, %v60_v26  ;;  %v66_v40 = vshrl.u32 %v334_v33, %v60_v26  ;;  %v69_v41 = vshrl.u32 %v335_v35, %v60_v26  ;;  %v61_v42 = vshrl.u32 %v332_v27, %v60_v26 }
  0x91   :  { %v72_v43 = vshrl.u32 %v336_v37, %v60_v26  ;;  %v75_v45 = vshrl.u32 %v337_v44, %v60_v26  ;;  %vm160_vm3 = vcmp.gt.s32.totalorder %v159_v30, 0  ;;  %vm80_vm4 = vcmp.lt.s32.totalorder %v58_v23, 4 }
  0x92   :  { %v64_v46 = vor.u32 %v63_v39, %v62_v28  ;;  %v67_v47 = vor.u32 %v66_v40, %v65_v32  ;;  %v70_v48 = vor.u32 %v69_v41, %v68_v34  ;;  %v161_v51 = vsel %vm160_vm3, %v159_v30, 0 }
  0x93   :  { %v73_v49 = vor.u32 %v72_v43, %v71_v36  ;;  %v76_v50 = vor.u32 %v75_v45, %v74_v38  ;;  %vm78_vm5 = vcmp.lt.s32.totalorder %v58_v23, 2  ;;  %v163_v62 = vand.u32 31, %v161_v51 }
  0x94   :  { %v81_v52 = vsel %vm77_vm1, %v61_v42, %v64_v46  ;;  %v82_v53 = vsel %vm80_vm4, %v70_v48, 2102212464  ;;  %v85_v54 = vsel %vm77_vm1, %v64_v46, %v67_v47  ;;  %v89_v55 = vsel %vm77_vm1, %v67_v47, %v70_v48 }
  0x95   :  { %v83_v56 = vsel %vm79_vm2, %v67_v47, %v82_v53  ;;  %v86_v57 = vsel %vm80_vm4, %v73_v49, 920167782  ;;  %v90_v58 = vsel %vm80_vm4, %v76_v50, 1326507024  ;;  %v162_v6 = vshrl.u32 %v161_v51, 5 }
  0x96   :  { %v87_v60 = vsel %vm79_vm2, %v70_v48, %v86_v57  ;;  %v91_v61 = vsel %vm79_vm2, %v73_v49, %v90_v58  ;;  %v84_v63 = vsel %vm78_vm5, %v81_v52, %v83_v56  ;;  %v164_v8 = vsub.s32 32, %v163_v62 }
  0x97   :  { %v88_v0 = vsel %vm78_vm5, %v85_v54, %v87_v60  ;;  %v92_v1 = vsel %vm78_vm5, %v89_v55, %v91_v61  ;;  %v100_v11 = vmul.u32 %v383_v25, %v84_v63  ;;  %v166_v12 = vshll.u32 %v332_v27, %v163_v62 }
  0x98   :  { %v396_v2 = vmul.u32.u64.low %v383_v25, %v92_v1  ;;  %v397_v3 = vmul.u32.u64.high %v383_v25, %v92_v1, %v396_v2  ;;  %v400_v4 = vmul.u32.u64.low %v383_v25, %v88_v0  ;;  %v401_v5 = vmul.u32.u64.high %v383_v25, %v88_v0, %v400_v4 }
  0x99   :  { %v169_v14 = vshll.u32 %v333_v31, %v163_v62  ;;  %v172_v15 = vshll.u32 %v334_v33, %v163_v62  ;;  %v167_v16 = vshrl.u32 %v333_v31, %v164_v8  ;;  %v170_v17 = vshrl.u32 %v334_v33, %v164_v8 }
  0x9a   :  { %v173_v18 = vshrl.u32 %v335_v35, %v164_v8  ;;  %v175_v19 = vshll.u32 %v335_v35, %v163_v62  ;;  %vm102_vm6 = vc.u32 %v397_v3, %v400_v4  ;;  %v103_v21 = vadd.s32 1, %v401_v5 }
  0x9b   :  { %v176_v22 = vshrl.u32 %v336_v37, %v164_v8  ;;  %v178_v23 = vshll.u32 %v336_v37, %v163_v62  ;;  %v168_v24 = vor.u32 %v167_v16, %v166_v12  ;;  %v171_v26 = vor.u32 %v170_v17, %v169_v14 }
  0x9c   :  { %v174_v28 = vor.u32 %v173_v18, %v172_v15  ;;  %v179_v29 = vshrl.u32 %v337_v44, %v164_v8  ;;  %v104_v25 = vsel %vm102_vm6, %v103_v21, %v401_v5  ;;  %vm181_vm7 = vcmp.lt.s32.totalorder %v162_v6, 1 }
  0x9d   :  { %v177_v30 = vor.u32 %v176_v22, %v175_v19  ;;  %vm184_vm8 = vcmp.lt.s32.totalorder %v162_v6, 4  ;;  %v105_v31 = vadd.s32 %v104_v25, %v100_v11  ;;  %vm183_vm9 = vcmp.lt.s32.totalorder %v162_v6, 3 }
  0x9e   :  { %v180_v32 = vor.u32 %v179_v29, %v178_v23  ;;  %v186_v33 = vsel %vm184_vm8, %v174_v28, 2102212464  ;;  %v165_v34 = vshrl.u32 %v332_v27, %v164_v8  ;;  %v189_v35 = vsel %vm181_vm7, %v168_v24, %v171_v26 }
  0x9f   :  { %v190_v36 = vsel %vm184_vm8, %v177_v30, 920167782  ;;  %v193_v38 = vsel %vm181_vm7, %v171_v26, %v174_v28  ;;  %v106_v39 = vadd.s32 536870912, %v105_v31  ;;  %vm182_vm10 = vcmp.lt.s32.totalorder %v162_v6, 2 }
  0xa0   :  { %v191_v37 = vsel %vm183_vm9, %v174_v28, %v190_v36  ;;  %v194_v40 = vsel %vm184_vm8, %v180_v32, 1326507024  ;;  %v185_v41 = vsel %vm181_vm7, %v165_v34, %v168_v24  ;;  %v187_v42 = vsel %vm183_vm9, %v171_v26, %v186_v33 }
  0xa1   :  { %v192_v43 = vsel %vm182_vm10, %v189_v35, %v191_v37  ;;  %v195_v44 = vsel %vm183_vm9, %v177_v30, %v194_v40  ;;  %v107_v45 = vshrl.u32 %v106_v39, 30  ;;  %v188_v51 = vsel %vm182_vm10, %v185_v41, %v187_v42 }
  0xa2   :  { %v196_v46 = vsel %vm182_vm10, %v193_v38, %v195_v44  ;;  %v411_v47 = vmul.u32.u64.low %v197_v10, %v192_v43  ;;  %v412_v48 = vmul.u32.u64.high %v197_v10, %v192_v43, %v411_v47  ;;  %v204_v54 = vmul.u32 %v197_v10, %v188_v51 }
  0xa3   :  { %v414_v49 = vmul.u32.u64.low %v197_v10, %v196_v46  ;;  %v415_v50 = vmul.u32.u64.high %v197_v10, %v196_v46, %v414_v49  ;;  %v108_v27 = vshll.u32 %v107_v45, 30  ;;  %v101_v2 = vadd.s32 %v400_v4, %v397_v3 }
  0xa4   :  { %v207_v53 = vadd.s32 1, %v412_v48  ;;  %v131_v29 = vsub.s32 4, %v107_v45  ;;  %vm430_vm1 = vcmp.le.f32.partialorder %v149_v20, 0.7853982  ;;  %vm253_vm5 = vcmask 261120  }
  0xa5   :  { %v109_v52 = vsub.s32 %v105_v31, %v108_v27  ;;  %vm206_vm11 = vc.u32 %v415_v50, %v411_v47  ;;  %v205_v26 = vadd.s32 %v411_v47, %v415_v50  ;;  %vm137_vm6 = vweird.f32 %v373_v7 }
  0xa6   :  { %v208_v56 = vsel %vm206_vm11, %v207_v53, %v412_v48  ;;  %v132_v36 = vsel %vm47_vm14, %v131_v29, %v107_v45  ;;  %vm241_vm10 = vweird.f32 %v377_v13 }
  0xa7   :  { %v111_v55 = vsub.s32 0, %v109_v52  ;;  %v209_v57 = vadd.s32 %v208_v56, %v204_v54  ;;  %v134_v40 = vsel %vm46_vm15, 0, %v132_v36 }
  0xa8   :  { %v138_v43 = vadd.s32 3, %v134_v40 }
  0xa9   :  { %v275_v58 = vmin.u32 %v111_v55, %v109_v52  ;;  %v210_v59 = vadd.s32 536870912, %v209_v57 }
  0xaa   :  { %v139_v47 = vand.u32 3, %v138_v43 }
  0xab   :  { %v113_v60 = vclz %v275_v58  ;;  %v211_v61 = vshrl.u32 %v210_v59, 30 }
  0xac   :  { %vm144_vm2 = vcmp.eq.s32.totalorder %v139_v47, 2  ;;  %vm141_vm3 = vcmp.eq.s32.totalorder %v139_v47, 0  ;;  %vm140_vm4 = vcmp.lt.s32.totalorder %v139_v47, 2 }
  0xad   :  { %v276_v62 = vadd.s32 4294967294, %v113_v60  ;;  %v212_v63 = vshll.u32 %v211_v61, 30  ;;  %v235_v44 = vsub.s32 4, %v211_v61 }
  0xaf   :  { %vm277_vm12 = vcmp.lt.s32.totalorder %v276_v62, 0  ;;  %v213_v1 = vsub.s32 %v209_v57, %v212_v63  ;;  %v236_v48 = vsel %vm151_vm0, %v235_v44, %v211_v61 }
  0xb0   :  { %v116_v0 = vsel %vm277_vm12, 0, %v276_v62  ;;  %v238_v20 = vsel %vm430_vm1, 0, %v236_v48 }
  0xb1   :  { %v117_v5 = vsub.s32 32, %v116_v0  ;;  %v121_v6 = vsub.s32 4294967266, %v116_v0  ;;  %v215_v8 = vsub.s32 0, %v213_v1  ;;  %v118_v10 = vshll.u32 %v109_v52, %v116_v0 }
  0xb2   :  { %v242_v55 = vadd.s32 3, %v238_v20 }
  0xb3   :  { %v119_v11 = vshrl.u32 %v101_v2, %v117_v5  ;;  %v122_v12 = vadd.s32 127, %v121_v6  ;;  %v279_v14 = vmin.u32 %v215_v8, %v213_v1 }
  0xb4   :  { %v243_v57 = vand.u32 3, %v242_v55 }
  0xb5   :  { %v120_v15 = vor.u32 %v119_v11, %v118_v10  ;;  %v123_v16 = vshll.u32 %v122_v12, 23  ;;  %v217_v17 = vclz %v279_v14 }
  0xb6   :  { %vm248_vm7 = vcmp.eq.s32.totalorder %v243_v57, 2  ;;  %vm245_vm8 = vcmp.eq.s32.totalorder %v243_v57, 0  ;;  %vm244_vm9 = vcmp.lt.s32.totalorder %v243_v57, 2 }
  0xb7   :  { %v124_v18 = vor.u32 4788187, %v123_v16  ;;  %v280_v19 = vadd.s32 4294967294, %v217_v17  ;;  %v127_v22 = vcvt.s32.f32 %v120_v15 }
  0xb9   :  { %v125_v21 = vand.u32 2147483647, %v124_v18  ;;  %vm281_vm13 = vcmp.lt.s32.totalorder %v280_v19, 0 }
  0xba   :  { %v220_v24 = vsel %vm281_vm13, 0, %v280_v19 }
  0xbb   :  { %v128_v23 = vmul.f32 %v127_v22, %v125_v21  ;;  %v221_v3 = vsub.s32 32, %v220_v24  ;;  %v225_v4 = vsub.s32 4294967266, %v220_v24  ;;  %v222_v25 = vshll.u32 %v213_v1, %v220_v24 }
  0xbd   :  { %v129_v28 = vxor.u32 2147483648, %v128_v23  ;;  %v223_v30 = vshrl.u32 %v205_v26, %v221_v3  ;;  %v226_v31 = vadd.s32 127, %v225_v4 }
  0xbf   :  { %v130_v32 = vsel %vm47_vm14, %v129_v28, %v128_v23  ;;  %v224_v34 = vor.u32 %v223_v30, %v222_v25  ;;  %v227_v35 = vshll.u32 %v226_v31, 23 }
  0xc0   :  { %v133_v33 = vsel %vm46_vm15, %v373_v7, %v130_v32 }
  0xc1   :  { %301 = vcosq.f32 %v133_v33  ;;  %v228_v38 = vor.u32 4788187, %v227_v35  ;;  %v231_v37 = vcvt.s32.f32 %v224_v34 }
  0xc2   :  { %303 = vsinq.f32 %v133_v33 }
  0xc3   :  { %v229_v39 = vand.u32 2147483647, %v228_v38 }
  0xc5   :  { %v232_v41 = vmul.f32 %v231_v37, %v229_v39 }
  0xc7   :  { %v233_v42 = vxor.u32 2147483648, %v232_v41 }
  0xc9   :  { %v234_v46 = vsel %vm151_vm0, %v233_v42, %v232_v41 }
  0xca   :  { %v237_v45 = vsel %vm430_vm1, %v377_v13, %v234_v46 }
  0xcb   :  { %305 = vcosq.f32 %v237_v45 }
  0xcc   :  { %307 = vsinq.f32 %v237_v45 }
  0xce   :  { %v302_v49 = vpop.eup %301 }
  0xcf   :  { %v304_v50 = vpop.eup %303  ;;  %v145_v27 = vxor.u32 2147483648, %v302_v49 }
  0xd0   :  { %v142_v51 = vxor.u32 2147483648, %v304_v50 }
  0xd1   :  { %v146_v52 = vsel %vm144_vm2, %v145_v27, %v304_v50 }
  0xd2   :  { %v143_v53 = vsel %vm141_vm3, %v302_v49, %v142_v51 }
  0xd3   :  { %v147_v54 = vsel %vm140_vm4, %v143_v53, %v146_v52 }
  0xd4   :  { %v148_v56 = vsel %vm137_vm6, nan, %v147_v54 }
  0xd5   :  { %254 = vst.msk [vmem:[#allocation2] sm:$0xff] %vm253_vm5, %v148_v56 }
  0xd8   :  { %v306_v58 = vpop.eup %305 }
  0xd9   :  { %v308_v59 = vpop.eup %307  ;;  %v249_v60 = vxor.u32 2147483648, %v306_v58 }
  0xda   :  { %v246_v61 = vxor.u32 2147483648, %v308_v59 }
  0xdb   :  { %v250_v62 = vsel %vm248_vm7, %v249_v60, %v308_v59 }
  0xdc   :  { %v247_v63 = vsel %vm245_vm8, %v306_v58, %v246_v61 }
  0xdd   :  { %v251_v7 = vsel %vm244_vm9, %v247_v63, %v250_v62 }
  0xde   :  { %v252_v0 = vsel %vm241_vm10, nan, %v251_v7 }
  0xdf   :  { %255 = vst.msk [vmem:[#allocation2 + $0x8] sm:$0xff] %vm253_vm5, %v252_v0 }
  0xe0   :  { %320 = shalt.err (!%p317_p4)
}
  0xe1   :  { %s339_s20 = smov 128   ;;  %s340_s21 = smov 8  }
  0xe2   :  { %267 = dma.vmem_to_hbm [thread:$0]  %s262_s1, 256, %s449_s3, [#allocation3], %s339_s20, %s339_s20, %s340_s21  }
  0xe3   :  { %329 = dma.done.wait [#allocation3], 256  }
  0xe4   :  { %330 = vsyncadd [#allocation3], 4294967040 }
  0xe5   :  { %271 = vsyncpa [#allocation3], 1 }

</bundles_post_ra>
